<compile_context>
chip_gen: v5e
topology: v5e:2x2
jax: 0.10.0
libtpu: 0.0.40
codegen_flags: <defaults>
</compile_context>

<pallas_src>
import functools

import jax
import jax.numpy as jnp
from jax import lax
from jax.experimental import pallas as pl
from jax.experimental.pallas import tpu as pltpu

LANE = 128     # TPU lane width; all packed slabs / outputs use this lane count
HIDDEN = 16    # fc1 / fc2 hidden width from the PyTorch module


def _round_up(x, m):
    return (x + m - 1) // m * m


def actor_kernel(state_ref, slab_ref, gumbel_ref, out_ref, *,
                 state_dim, action_num, r_w2, r_w3, r_bias):
    x = state_ref[...]                                    # (TM, S) f32

    # Static slices into the packed, zero-padded weight slab (single DMA'd input).
    w1 = slab_ref[0:state_dim, :]                         # (S,   128) cols>=16 are 0
    w2 = slab_ref[r_w2:r_w2 + LANE, :]                    # (128, 128) rows/cols>=16 are 0
    w3 = slab_ref[r_w3:r_w3 + LANE, :]                    # (128, 128) cols>=A are 0
    bias = slab_ref[r_bias:r_bias + 8, :]                 # (8, 128): rows 0/1/2 = b1/b2/b3
    b1 = bias[0:1, :]
    b2 = bias[1:2, :]
    b3 = bias[2:3, :]

    # fc1 -> relu ; padded lanes (>=16) stay exactly 0 through the whole MLP.
    h1 = jnp.maximum(jnp.dot(x, w1, preferred_element_type=jnp.float32) + b1, 0.0)
    # fc2 -> relu
    h2 = jnp.maximum(jnp.dot(h1, w2, preferred_element_type=jnp.float32) + b2, 0.0)
    # fc3 logits (lanes >= action_num are 0; masked below before the softmax)
    logits = jnp.dot(h2, w3, preferred_element_type=jnp.float32) + b3   # (TM, 128)

    col = lax.broadcasted_iota(jnp.int32, logits.shape, 1)
    valid = col < action_num
    neg = jnp.float32(-1e30)

    # --- Categorical sampling: Gumbel-max directly on logits (shift-invariant,
    # identical distribution to sampling from softmax probs), independent of the
    # softmax reduction chain.
    score = jnp.where(valid, logits + gumbel_ref[...], neg)
    smax = jnp.max(score, axis=1, keepdims=True)
    act = jnp.min(jnp.where(score >= smax, col, jnp.int32(2 ** 30)),
                  axis=1, keepdims=True)                  # (TM, 1) int32

    # --- log-softmax statistics over dim=1 without materializing probs.
    logits_m = jnp.where(valid, logits, neg)
    m = jnp.max(logits_m, axis=1, keepdims=True)
    z = logits_m - m
    ez = jnp.exp(z)
    denom = jnp.sum(ez, axis=1, keepdims=True)
    log_denom = jnp.log(denom)
    inv_denom = 1.0 / denom
    log_probs = z - log_denom                             # (TM, 128)

    # entropy = -sum p*log p = log(denom) - sum(ez*z)/denom
    ent = log_denom - jnp.sum(jnp.where(valid, ez * z, 0.0),
                              axis=1, keepdims=True) * inv_denom      # (TM, 1)
    # log_prob of the sampled action (one-hot select gather)
    logp = jnp.sum(jnp.where(col == act, log_probs, 0.0),
                   axis=1, keepdims=True)                              # (TM, 1)

    # --- single lane-dense output: lane0 = log_prob, lane1 = entropy,
    # lane2 = action (as float; small ints are exactly representable).
    act_f = act.astype(jnp.float32)
    out_ref[...] = jnp.where(col == 0, logp,
                   jnp.where(col == 1, ent,
                   jnp.where(col == 2, act_f, 0.0)))


def pack_params(params, state_dim, action_num):
    """Pack (w1,b1,w2,b2,w3,b3) into one zero-padded (R, 128) f32 slab."""
    w1, b1, w2, b2, w3, b3 = params
    r_w2 = _round_up(state_dim, 8)
    r_w3 = r_w2 + LANE
    r_bias = r_w3 + LANE
    rows = r_bias + 8
    slab = jnp.zeros((rows, LANE), jnp.float32)
    slab = slab.at[0:state_dim, 0:HIDDEN].set(w1)
    slab = slab.at[r_w2:r_w2 + HIDDEN, 0:HIDDEN].set(w2)
    slab = slab.at[r_w3:r_w3 + HIDDEN, 0:action_num].set(w3)
    slab = slab.at[r_bias + 0, 0:HIDDEN].set(b1.reshape(HIDDEN))
    slab = slab.at[r_bias + 1, 0:HIDDEN].set(b2.reshape(HIDDEN))
    slab = slab.at[r_bias + 2, 0:action_num].set(b3.reshape(action_num))
    return slab, (r_w2, r_w3, r_bias)


def actor_forward(state, params, key, *, action_num, block_rows=256):
    """Returns (act[B] int32, act_log_prob[B] f32, act_entropy[B] f32)."""
    # TODO(synk): optional `action=` passthrough of the PyTorch forward (scoring a
    # given action instead of sampling) is not implemented; sampling path only.
    state = jnp.asarray(state, jnp.float32)
    B, state_dim = state.shape
    slab, (r_w2, r_w3, r_bias) = pack_params(params, state_dim, action_num)

    tm = min(_round_up(B, 8), block_rows)      # row tile; weights stay resident
    b_pad = _round_up(B, tm)
    if b_pad != B:
        state = jnp.pad(state, ((0, b_pad - B), (0, 0)))

    # Host-side Gumbel noise (exact categorical sampling via Gumbel-max in-kernel);
    # avoids pltpu.prng_* which lacks a CPU/interpret lowering.
    gumbel = jax.random.gumbel(key, (b_pad, LANE), jnp.float32)

    kernel = functools.partial(
        actor_kernel, state_dim=state_dim, action_num=action_num,
        r_w2=r_w2, r_w3=r_w3, r_bias=r_bias)

    out = pl.pallas_call(
        kernel,
        out_shape=jax.ShapeDtypeStruct((b_pad, LANE), jnp.float32),
        grid=(b_pad // tm,),
        in_specs=[
            pl.BlockSpec((tm, state_dim), lambda i: (i, 0)),
            pl.BlockSpec((slab.shape[0], LANE), lambda i: (0, 0)),  # resident weights
            pl.BlockSpec((tm, LANE), lambda i: (i, 0)),
        ],
        out_specs=pl.BlockSpec((tm, LANE), lambda i: (i, 0)),
        compiler_params=pltpu.CompilerParams(
            dimension_semantics=("parallel",)),
    )(state, slab, gumbel)

    act = out[:B, 2].astype(jnp.int32)
    act_log_prob = out[:B, 0]
    act_entropy = out[:B, 1]
    return act, act_log_prob, act_entropy


def init_params(key, state_dim, action_num):
    """Deterministic init mimicking torch.nn.Linear default U[-1/sqrt(fan_in), ...]."""
    ks = jax.random.split(key, 6)

    def linear(kw, kb, fan_in, fan_out):
        bound = 1.0 / (fan_in ** 0.5)
        w = jax.random.uniform(kw, (fan_in, fan_out), jnp.float32, -bound, bound)
        b = jax.random.uniform(kb, (1, fan_out), jnp.float32, -bound, bound)
        return w, b

    w1, b1 = linear(ks[0], ks[1], state_dim, HIDDEN)
    w2, b2 = linear(ks[2], ks[3], HIDDEN, HIDDEN)
    w3, b3 = linear(ks[4], ks[5], HIDDEN, action_num)
    return (w1, b1, w2, b2, w3, b3)


if __name__ == "__main__":
    B, STATE_DIM, ACTION_NUM = 8, 32, 4

    key = jax.random.PRNGKey(0)
    k_param, k_state, k_noise = jax.random.split(key, 3)
    params = init_params(k_param, STATE_DIM, ACTION_NUM)
    state = jax.random.normal(k_state, (B, STATE_DIM), dtype=jnp.float32)

    act, act_log_prob, act_entropy = actor_forward(
        state, params, k_noise, action_num=ACTION_NUM)
    jax.block_until_ready((act, act_log_prob, act_entropy))

    # Shape / range sanity.
    assert act.shape == (B,) and act_log_prob.shape == (B,) and act_entropy.shape == (B,)
    assert bool(jnp.all((act >= 0) & (act < ACTION_NUM)))
    assert bool(jnp.all(jnp.isfinite(act_log_prob))) and bool(jnp.all(act_log_prob <= 0.0))
    assert bool(jnp.all(jnp.isfinite(act_entropy))) and bool(jnp.all(act_entropy >= 0.0))

    # Numerical check against a pure-JAX reference of the same forward pass.
    w1, b1, w2, b2, w3, b3 = params
    h1 = jnp.maximum(state @ w1 + b1, 0.0)
    h2 = jnp.maximum(h1 @ w2 + b2, 0.0)
    logits = h2 @ w3 + b3
    ref_logp_all = jax.nn.log_softmax(logits, axis=1)
    ref_ent = -jnp.sum(jnp.exp(ref_logp_all) * ref_logp_all, axis=1)
    ref_logp = jnp.take_along_axis(ref_logp_all, act[:, None], axis=1)[:, 0]
    assert bool(jnp.allclose(act_entropy, ref_ent, rtol=1e-4, atol=1e-4))
    assert bool(jnp.allclose(act_log_prob, ref_logp, rtol=1e-4, atol=1e-4))

    print("KERNEL_OK")
</pallas_src>

<mosaic_0001>
module attributes {stable_mosaic.version = 11 : i64} {
  func.func @actor_kernel(%arg0: i32, %arg1: memref<8x32xf32, #tpu.memory_space<vmem>>, %arg2: memref<296x128xf32, #tpu.memory_space<vmem>>, %arg3: memref<8x128xf32, #tpu.memory_space<vmem>>, %arg4: memref<8x128xf32, #tpu.memory_space<vmem>>) attributes {dimension_semantics = [#tpu.dimension_semantics<parallel>], iteration_bounds = array<i64: 1>, scalar_prefetch = 0 : i64, scratch_operands = 0 : i64, tpu.core_type = #tpu.core_type<tc>, window_params = [{transform_indices = @transform_0, window_bounds = array<i64: 8, 32>}, {pipeline_mode = #tpu.pipeline_mode<synchronous>, transform_indices = @transform_1, window_bounds = array<i64: 296, 128>}, {transform_indices = @transform_2, window_bounds = array<i64: 8, 128>}, {transform_indices = @transform_3, window_bounds = array<i64: 8, 128>}]} {
    %c0 = arith.constant 0 : index
    %c0_0 = arith.constant 0 : index
    %0 = vector.load %arg1[%c0, %c0_0] : memref<8x32xf32, #tpu.memory_space<vmem>>, vector<8x32xf32>
    %c0_1 = arith.constant 0 : index
    %c0_2 = arith.constant 0 : index
    %1 = vector.load %arg2[%c0_1, %c0_2] : memref<296x128xf32, #tpu.memory_space<vmem>>, vector<32x128xf32>
    %c32 = arith.constant 32 : index
    %c0_3 = arith.constant 0 : index
    %2 = vector.load %arg2[%c32, %c0_3] : memref<296x128xf32, #tpu.memory_space<vmem>>, vector<128x128xf32>
    %c160 = arith.constant 160 : index
    %c0_4 = arith.constant 0 : index
    %3 = vector.load %arg2[%c160, %c0_4] : memref<296x128xf32, #tpu.memory_space<vmem>>, vector<128x128xf32>
    %c288 = arith.constant 288 : index
    %c0_5 = arith.constant 0 : index
    %4 = vector.load %arg2[%c288, %c0_5] : memref<296x128xf32, #tpu.memory_space<vmem>>, vector<8x128xf32>
    %5 = vector.extract_strided_slice %4 {offsets = [0, 0], sizes = [1, 128], strides = [1, 1]} : vector<8x128xf32> to vector<1x128xf32>
    %6 = vector.extract_strided_slice %4 {offsets = [1, 0], sizes = [1, 128], strides = [1, 1]} : vector<8x128xf32> to vector<1x128xf32>
    %7 = vector.extract_strided_slice %4 {offsets = [2, 0], sizes = [1, 128], strides = [1, 1]} : vector<8x128xf32> to vector<1x128xf32>
    %cst = arith.constant dense<0.000000e+00> : vector<8x128xf32>
    %8 = tpu.matmul %0, %1, %cst {dimension_numbers = #tpu.dot_dimension_numbers<[1], [0], [0], [1], [0, 0, 1, 1], [], []>} : vector<8x32xf32>, vector<32x128xf32>, vector<8x128xf32> -> vector<8x128xf32>
    %9 = vector.broadcast %5 : vector<1x128xf32> to vector<8x128xf32>
    %10 = arith.addf %8, %9 : vector<8x128xf32>
    %cst_6 = arith.constant 0.000000e+00 : f32
    %11 = vector.broadcast %cst_6 : f32 to vector<8x128xf32>
    %12 = arith.maximumf %10, %11 : vector<8x128xf32>
    %cst_7 = arith.constant dense<0.000000e+00> : vector<8x128xf32>
    %13 = tpu.matmul %12, %2, %cst_7 {dimension_numbers = #tpu.dot_dimension_numbers<[1], [0], [0], [1], [0, 0, 1, 1], [], []>} : vector<8x128xf32>, vector<128x128xf32>, vector<8x128xf32> -> vector<8x128xf32>
    %14 = vector.broadcast %6 : vector<1x128xf32> to vector<8x128xf32>
    %15 = arith.addf %13, %14 : vector<8x128xf32>
    %cst_8 = arith.constant 0.000000e+00 : f32
    %16 = vector.broadcast %cst_8 : f32 to vector<8x128xf32>
    %17 = arith.maximumf %15, %16 : vector<8x128xf32>
    %cst_9 = arith.constant dense<0.000000e+00> : vector<8x128xf32>
    %18 = tpu.matmul %17, %3, %cst_9 {dimension_numbers = #tpu.dot_dimension_numbers<[1], [0], [0], [1], [0, 0, 1, 1], [], []>} : vector<8x128xf32>, vector<128x128xf32>, vector<8x128xf32> -> vector<8x128xf32>
    %19 = vector.broadcast %7 : vector<1x128xf32> to vector<8x128xf32>
    %20 = arith.addf %18, %19 : vector<8x128xf32>
    %21 = tpu.iota {dimensions = array<i32: 1>} : vector<8x128xi32>
    %c4_i32 = arith.constant 4 : i32
    %22 = vector.broadcast %c4_i32 : i32 to vector<8x128xi32>
    %23 = arith.cmpi slt, %21, %22 : vector<8x128xi32>
    %c0_10 = arith.constant 0 : index
    %c0_11 = arith.constant 0 : index
    %24 = vector.load %arg3[%c0_10, %c0_11] : memref<8x128xf32, #tpu.memory_space<vmem>>, vector<8x128xf32>
    %25 = arith.addf %20, %24 : vector<8x128xf32>
    %cst_12 = arith.constant -1.000000e+30 : f32
    %26 = vector.broadcast %cst_12 : f32 to vector<8x128xf32>
    %27 = arith.select %23, %25, %26 : vector<8x128xi1>, vector<8x128xf32>
    %cst_13 = arith.constant dense<0xFF800000> : vector<8xf32>
    %28 = vector.multi_reduction <maximumf>, %27, %cst_13 [1] : vector<8x128xf32> to vector<8xf32>
    %29 = vector.shape_cast %28 : vector<8xf32> to vector<8x1xf32>
    %30 = vector.broadcast %29 : vector<8x1xf32> to vector<8x128xf32>
    %31 = arith.cmpf oge, %27, %30 : vector<8x128xf32>
    %c1073741824_i32 = arith.constant 1073741824 : i32
    %32 = vector.broadcast %c1073741824_i32 : i32 to vector<8x128xi32>
    %33 = arith.select %31, %21, %32 : vector<8x128xi1>, vector<8x128xi32>
    %cst_14 = arith.constant dense<2147483647> : vector<8xi32>
    %34 = vector.multi_reduction <minsi>, %33, %cst_14 [1] : vector<8x128xi32> to vector<8xi32>
    %35 = vector.shape_cast %34 : vector<8xi32> to vector<8x1xi32>
    %cst_15 = arith.constant -1.000000e+30 : f32
    %36 = vector.broadcast %cst_15 : f32 to vector<8x128xf32>
    %37 = arith.select %23, %20, %36 : vector<8x128xi1>, vector<8x128xf32>
    %cst_16 = arith.constant dense<0xFF800000> : vector<8xf32>
    %38 = vector.multi_reduction <maximumf>, %37, %cst_16 [1] : vector<8x128xf32> to vector<8xf32>
    %39 = vector.shape_cast %38 : vector<8xf32> to vector<8x1xf32>
    %40 = vector.broadcast %39 : vector<8x1xf32> to vector<8x128xf32>
    %41 = arith.subf %37, %40 : vector<8x128xf32>
    %42 = math.exp %41 : vector<8x128xf32>
    %cst_17 = arith.constant dense<0.000000e+00> : vector<8xf32>
    %43 = vector.multi_reduction <add>, %42, %cst_17 [1] : vector<8x128xf32> to vector<8xf32>
    %44 = vector.shape_cast %43 : vector<8xf32> to vector<8x1xf32>
    %45 = math.log %44 : vector<8x1xf32>
    %cst_18 = arith.constant 1.000000e+00 : f32
    %46 = vector.broadcast %cst_18 : f32 to vector<8x1xf32>
    %47 = arith.divf %46, %44 : vector<8x1xf32>
    %48 = vector.broadcast %45 : vector<8x1xf32> to vector<8x128xf32>
    %49 = arith.subf %41, %48 : vector<8x128xf32>
    %50 = arith.mulf %42, %41 : vector<8x128xf32>
    %cst_19 = arith.constant 0.000000e+00 : f32
    %51 = vector.broadcast %cst_19 : f32 to vector<8x128xf32>
    %52 = arith.select %23, %50, %51 : vector<8x128xi1>, vector<8x128xf32>
    %cst_20 = arith.constant dense<0.000000e+00> : vector<8xf32>
    %53 = vector.multi_reduction <add>, %52, %cst_20 [1] : vector<8x128xf32> to vector<8xf32>
    %54 = vector.shape_cast %53 : vector<8xf32> to vector<8x1xf32>
    %55 = arith.mulf %54, %47 : vector<8x1xf32>
    %56 = arith.subf %45, %55 : vector<8x1xf32>
    %57 = vector.broadcast %35 : vector<8x1xi32> to vector<8x128xi32>
    %58 = arith.cmpi eq, %21, %57 : vector<8x128xi32>
    %cst_21 = arith.constant 0.000000e+00 : f32
    %59 = vector.broadcast %cst_21 : f32 to vector<8x128xf32>
    %60 = arith.select %58, %49, %59 : vector<8x128xi1>, vector<8x128xf32>
    %cst_22 = arith.constant dense<0.000000e+00> : vector<8xf32>
    %61 = vector.multi_reduction <add>, %60, %cst_22 [1] : vector<8x128xf32> to vector<8xf32>
    %62 = vector.shape_cast %61 : vector<8xf32> to vector<8x1xf32>
    %63 = arith.sitofp %35 : vector<8x1xi32> to vector<8x1xf32>
    %c0_i32 = arith.constant 0 : i32
    %64 = vector.broadcast %c0_i32 : i32 to vector<8x128xi32>
    %65 = arith.cmpi eq, %21, %64 : vector<8x128xi32>
    %c1_i32 = arith.constant 1 : i32
    %66 = vector.broadcast %c1_i32 : i32 to vector<8x128xi32>
    %67 = arith.cmpi eq, %21, %66 : vector<8x128xi32>
    %c2_i32 = arith.constant 2 : i32
    %68 = vector.broadcast %c2_i32 : i32 to vector<8x128xi32>
    %69 = arith.cmpi eq, %21, %68 : vector<8x128xi32>
    %cst_23 = arith.constant 0.000000e+00 : f32
    %70 = vector.shape_cast %63 : vector<8x1xf32> to vector<8x1xf32>
    %71 = vector.broadcast %70 : vector<8x1xf32> to vector<8x128xf32>
    %72 = vector.broadcast %cst_23 : f32 to vector<8x128xf32>
    %73 = arith.select %69, %71, %72 : vector<8x128xi1>, vector<8x128xf32>
    %74 = vector.shape_cast %56 : vector<8x1xf32> to vector<8x1xf32>
    %75 = vector.broadcast %74 : vector<8x1xf32> to vector<8x128xf32>
    %76 = arith.select %67, %75, %73 : vector<8x128xi1>, vector<8x128xf32>
    %77 = vector.shape_cast %62 : vector<8x1xf32> to vector<8x1xf32>
    %78 = vector.broadcast %77 : vector<8x1xf32> to vector<8x128xf32>
    %79 = arith.select %65, %78, %76 : vector<8x128xi1>, vector<8x128xf32>
    %c0_24 = arith.constant 0 : index
    %c0_25 = arith.constant 0 : index
    %80 = vector.load %arg4[%c0_24, %c0_25] : memref<8x128xf32, #tpu.memory_space<vmem>>, vector<8x128xf32>
    tpu.vector_store %arg4[%c0_24, %c0_25], %79 {strides = array<i32>} : memref<8x128xf32, #tpu.memory_space<vmem>>, vector<8x128xf32>,
    return
  }
  func.func @transform_0(%arg0: i32) -> (i32, i32) {
    %c0_i32 = arith.constant 0 : i32
    %c0_i32_0 = arith.constant 0 : i32
    return %arg0, %c0_i32 : i32, i32
  }
  func.func @transform_1(%arg0: i32) -> (i32, i32) {
    %c0_i32 = arith.constant 0 : i32
    %c0_i32_0 = arith.constant 0 : i32
    %c0_i32_1 = arith.constant 0 : i32
    return %c0_i32, %c0_i32_0 : i32, i32
  }
  func.func @transform_2(%arg0: i32) -> (i32, i32) {
    %c0_i32 = arith.constant 0 : i32
    %c0_i32_0 = arith.constant 0 : i32
    return %arg0, %c0_i32 : i32, i32
  }
  func.func @transform_3(%arg0: i32) -> (i32, i32) {
    %c0_i32 = arith.constant 0 : i32
    %c0_i32_0 = arith.constant 0 : i32
    return %arg0, %c0_i32 : i32, i32
  }
}

</mosaic_0001>

<bundles_post_ra>
// kernel: tpu_custom_call.1
= control target key start
LH: loop header
LB: loop body
LE: loop exit
PB: predicated region body
PF: predicated region fallthrough
CT: control target
= control target key end

     0   :  { %8 = vsyncpa [#allocation3], 0  ;;  %s418_s0 = inlined_call_operand.hbm [shape: f32[8,32], index: 0, kind: input, shape index: {}]   ;;  %s419_s1 = inlined_call_operand.hbm [shape: f32[296,128], index: 1, kind: input, shape index: {}]   ;;  %s420_s2 = inlined_call_operand.hbm [shape: f32[8,128], index: 2, kind: input, shape index: {}]   ;;  %s421_s3 = inlined_call_operand.hbm [shape: f32[8,128], index: 3, kind: output, shape index: {}]  }
   0x1   :  { %9 = vsyncpa [#allocation6], 0  ;;  %s26_s14 = sshll.u32 %s419_s1, 4  ;;  %s27_s14 = int_to_ptr.hbm [resolvable:$true] %s26_s14 }
   0x2   :  { %10 = vsyncpa [#allocation4], 0  ;;  %s366_s15 = smov [#allocation5]   ;;  %s16_s19 = sshll.u32 %s418_s0, 4  ;;  %s17_s19 = int_to_ptr.hbm [resolvable:$true] %s16_s19 }
   0x3   :  { %s28_s16 = sshll.u32 %s366_s15, 4  ;;  %s367_s20 = smov 128   ;;  %s29_s16 = int_to_ptr.vmem [resolvable:$true] %s28_s16 }
   0x4   :  { %s368_s21 = smov 8   ;;  %s369_s22 = smov [#allocation2]  }
   0x5   :  { %34 = dma.hbm_to_vmem [thread:$0]  %s27_s14, 4736, %s29_s16, [#allocation6], %s367_s20, %s367_s20, %s368_s21  }
   0x6   :  { %s18_s23 = sshll.u32 %s369_s22, 4  ;;  %s40_s26 = sshll.u32 %s420_s2, 4  ;;  %s19_s23 = int_to_ptr.vmem [resolvable:$true] %s18_s23  ;;  %s41_s26 = int_to_ptr.hbm [resolvable:$true] %s40_s26 }
   0x7   :  { %21 = dma.hbm_to_vmem [thread:$0]  %s17_s19, 128, %s19_s23, [#allocation3]  }
   0x8   :  { %s370_s1 = smov [#allocation7]  }
   0x9   :  { %s42_s27 = sshll.u32 %s370_s1, 4  ;;  %s43_s27 = int_to_ptr.vmem [resolvable:$true] %s42_s27 }
   0xa   :  { %45 = dma.hbm_to_vmem [thread:$0]  %s41_s26, 128, %s43_s27, [#allocation6]  }
   0xb   :  { %360 = dma.done.wait [#allocation3], 128  }
   0xc   :  { %361 = vsyncadd [#allocation3], 4294967168 }
   0xd   :  { %362 = dma.done.wait [#allocation6], 4864  }
   0xe   :  { %363 = vsyncadd [#allocation6], 4294962432  ;;  %v62_v0 = vld [vmem:[#allocation5 + $0x18] sm:$0xff]  ;;  %v61_v1 = vld [vmem:[#allocation5 + $0x10] sm:$0xff]  ;;  %vm97_vm0 = vcmask 261120   ;;  %v165_v46 = vlaneseq  ;;  %s371_s0 = smov [#allocation8]  }
   0xf   :  { %113 = vmatpush.msra.mxu0 %v62_v0  ;;  %v78_v2 = vld [vmem:[#allocation5 + $0x98] sm:$0xff]  ;;  %v60_v3 = vld [vmem:[#allocation5 + $0x8] sm:$0xff]  ;;  %v77_v4 = vld [vmem:[#allocation5 + $0x90] sm:$0xff]  ;;  %s238_s2 = sshll.u32 %s371_s0, 4  ;;  %s240_s30 = sshll.u32 %s421_s3, 4  ;;  %s239_s2 = int_to_ptr.vmem [resolvable:$true] %s238_s2  ;;  %s241_s30 = int_to_ptr.hbm [resolvable:$true] %s240_s30 }
  0x10   :  { %123 = vmatpush.msra.mxu1 %v78_v2  ;;  %v76_v5 = vld [vmem:[#allocation5 + $0x88] sm:$0xff]  ;;  %v59_v6 = vld [vmem:[#allocation5] sm:$0xff]  ;;  %v58_v7 = vld [vmem:[#allocation2] sm:$0xff]  ;;  %v401_v49 = vand.u32 127, %v165_v46 }
  0x11   :  { %114 = vmatpush.msra.mxu0 %v61_v1  ;;  %v75_v8 = vld [vmem:[#allocation5 + $0x80] sm:$0xff]  ;;  %v74_v9 = vld [vmem:[#allocation5 + $0x78] sm:$0xff]  ;;  %v73_v10 = vld [vmem:[#allocation5 + $0x70] sm:$0xff] }
  0x12   :  { %124 = vmatpush.msra.mxu1 %v77_v4  ;;  %v72_v11 = vld [vmem:[#allocation5 + $0x68] sm:$0xff]  ;;  %v71_v12 = vld [vmem:[#allocation5 + $0x60] sm:$0xff]  ;;  %v70_v13 = vld [vmem:[#allocation5 + $0x58] sm:$0xff]  ;;  %vm167_vm1 = vcmp.lt.s32.totalorder %v401_v49, 4  ;;  %vm228_vm9 = vcmp.eq.s32.totalorder %v401_v49, 2  ;;  %vm227_vm10 = vcmp.eq.s32.totalorder %v401_v49, 1 }
  0x13   :  { %115 = vmatpush.msra.mxu0 %v60_v3  ;;  %v69_v14 = vld [vmem:[#allocation5 + $0x50] sm:$0xff]  ;;  %v68_v15 = vld [vmem:[#allocation5 + $0x48] sm:$0xff]  ;;  %v67_v16 = vld [vmem:[#allocation5 + $0x40] sm:$0xff]  ;;  %vm226_vm11 = vcmp.eq.s32.totalorder %v401_v49, 0 }
  0x14   :  { %125 = vmatpush.msra.mxu1 %v76_v5  ;;  %v66_v17 = vld [vmem:[#allocation5 + $0x38] sm:$0xff]  ;;  %v65_v18 = vld [vmem:[#allocation5 + $0x30] sm:$0xff]  ;;  %v64_v19 = vld [vmem:[#allocation5 + $0x28] sm:$0xff] }
  0x15   :  { %116 = vmatpush.msra.mxu0 %v59_v6  ;;  %v63_v20 = vld [vmem:[#allocation5 + $0x20] sm:$0xff]  ;;  %v94_v21 = vld [vmem:[#allocation5 + $0x118] sm:$0xff]  ;;  %v93_v22 = vld [vmem:[#allocation5 + $0x110] sm:$0xff] }
  0x16   :  { %251 = vmatmul.msk.f32.vlgmr.msra.gmra.mxu0 %vm97_vm0, %v58_v7  ;;  %126 = vmatpush.msra.mxu1 %v75_v8  ;;  %v92_v23 = vld [vmem:[#allocation5 + $0x108] sm:$0xff]  ;;  %v91_v24 = vld [vmem:[#allocation5 + $0x100] sm:$0xff]  ;;  %v90_v25 = vld [vmem:[#allocation5 + $0xf8] sm:$0xff] }
  0x17   :  { %145 = vmatpush.msra.mxu2 %v94_v21  ;;  %v89_v26 = vld [vmem:[#allocation5 + $0xf0] sm:$0xff]  ;;  %v88_v27 = vld [vmem:[#allocation5 + $0xe8] sm:$0xff]  ;;  %v87_v28 = vld [vmem:[#allocation5 + $0xe0] sm:$0xff] }
  0x18   :  { %127 = vmatpush.msra.mxu1 %v74_v9  ;;  %v86_v29 = vld [vmem:[#allocation5 + $0xd8] sm:$0xff]  ;;  %v85_v30 = vld [vmem:[#allocation5 + $0xd0] sm:$0xff]  ;;  %v84_v31 = vld [vmem:[#allocation5 + $0xc8] sm:$0xff] }
  0x19   :  { %146 = vmatpush.msra.mxu2 %v93_v22  ;;  %v83_v32 = vld [vmem:[#allocation5 + $0xc0] sm:$0xff]  ;;  %v82_v34 = vld [vmem:[#allocation5 + $0xb8] sm:$0xff]  ;;  %v81_v39 = vld [vmem:[#allocation5 + $0xb0] sm:$0xff] }
  0x1a   :  { %128 = vmatpush.msra.mxu1 %v73_v10  ;;  %v95_v33 = vld [vmem:[#allocation5 + $0x120] sm:$0xff]  ;;  %v80_v40 = vld [vmem:[#allocation5 + $0xa8] sm:$0xff] }
  0x1b   :  { %147 = vmatpush.msra.mxu2 %v92_v23  ;;  %v96_v35 = vperm.slane %v95_v33, 0  ;;  %v79_v41 = vld [vmem:[#allocation5 + $0xa0] sm:$0xff]  ;;  %v122_v42 = vperm.slane %v95_v33, 1  ;;  %v144_v47 = vperm.slane %v95_v33, 2  ;;  %v168_v50 = vld [vmem:[#allocation7] sm:$0xff] }
  0x1c   :  { %129 = vmatpush.msra.mxu1 %v72_v11 }
  0x1d   :  { %148 = vmatpush.msra.mxu2 %v91_v24 }
  0x1e   :  { %130 = vmatpush.msra.mxu1 %v71_v12 }
  0x1f   :  { %149 = vmatpush.msra.mxu2 %v90_v25 }
  0x20   :  { %131 = vmatpush.msra.mxu1 %v70_v13 }
  0x21   :  { %150 = vmatpush.msra.mxu2 %v89_v26 }
  0x22   :  { %132 = vmatpush.msra.mxu1 %v69_v14 }
  0x23   :  { %151 = vmatpush.msra.mxu2 %v88_v27 }
  0x24   :  { %133 = vmatpush.msra.mxu1 %v68_v15 }
  0x25   :  { %152 = vmatpush.msra.mxu2 %v87_v28 }
  0x26   :  { %134 = vmatpush.msra.mxu1 %v67_v16 }
  0x27   :  { %153 = vmatpush.msra.mxu2 %v86_v29 }
  0x28   :  { %135 = vmatpush.msra.mxu1 %v66_v17 }
  0x29   :  { %154 = vmatpush.msra.mxu2 %v85_v30 }
  0x2a   :  { %136 = vmatpush.msra.mxu1 %v65_v18 }
  0x2b   :  { %155 = vmatpush.msra.mxu2 %v84_v31 }
  0x2c   :  { %137 = vmatpush.msra.mxu1 %v64_v19 }
  0x2d   :  { %156 = vmatpush.msra.mxu2 %v83_v32 }
  0x2e   :  { %138 = vmatpush.msra.mxu1 %v63_v20 }
  0x2f   :  { %157 = vmatpush.msra.mxu2 %v82_v34 }
  0x31   :  { %158 = vmatpush.msra.mxu2 %v81_v39 }
  0x33   :  { %159 = vmatpush.msra.mxu2 %v80_v40 }
  0x35   :  { %160 = vmatpush.msra.mxu2 %v79_v41 }
  0x93   :  { %v118_v36 = vpop.f32.mrf.mxu0 }
  0x94   :  { %v119_v37 = vadd.f32 %v118_v36, %v96_v35 }
  0x96   :  { %v121_v38 = vmax.f32 %v119_v37, 0.0 }
  0x98   :  { %139 = vmatmul.f32.vlgmr.msra.gmra.mxu1 %v121_v38 }
 0x115   :  { %v140_v43 = vpop.f32.mrf.mxu1 }
 0x116   :  { %v141_v44 = vadd.f32 %v140_v43, %v122_v42 }
 0x118   :  { %v143_v45 = vmax.f32 %v141_v44, 0.0 }
 0x11a   :  { %161 = vmatmul.f32.vlgmr.msra.gmra.mxu2 %v143_v45 }
 0x19d   :  { %v162_v48 = vpop.f32.mrf.mxu2 }
 0x19e   :  { %v163_v51 = vadd.f32 %v162_v48, %v144_v47 }
 0x1a0   :  { %v169_v52 = vadd.f32 %v168_v50, %v163_v51  ;;  %v189_v54 = vsel %vm167_vm1, %v163_v51, -1e+30 }
 0x1a2   :  { %v170_v53 = vsel %vm167_vm1, %v169_v52, -1e+30 }
 0x1a3   :  { %171 = vmax.xlane.f32.xlu0 %v170_v53 }
 0x1ab   :  { %190 = vmax.xlane.f32.xlu0 %v189_v54 }
 0x216   :  { %v172_v55 = vpop.xlane.xlu0 %171 }
 0x217   :  { %vm173_vm2 = vcmp.ge.f32.partialorder %v170_v53, %v172_v55 }
 0x218   :  { %v174_v56 = vsel %vm173_vm2, %v401_v49, 1073741824 }
 0x219   :  { %v176_v57 = vshra.s32 %v174_v56, 16  ;;  %v175_v63 = vand.u32 65535, %v174_v56 }
 0x21b   :  { %v178_v58 = vcvt.s32.f32 %v176_v57  ;;  %v177_v1 = vcvt.s32.f32 %v175_v63 }
 0x21d   :  { %179 = vmin.xlane.f32.xlu1 %v178_v58 }
 0x21e   :  { %v191_v59 = vpop.xlane.xlu0 %190 }
 0x21f   :  { %v192_v60 = vsub.f32 %v189_v54, %v191_v59 }
 0x221   :  { %v193_v61 = vmul.f32 1.442695, %v192_v60 }
 0x223   :  { %258 = vpow2.f32 %v193_v61 }
 0x229   :  { %v259_v62 = vpop.eup %258 }
 0x22a   :  { %195 = vadd.xlane.f32.xlu1 %v259_v62  ;;  %v215_v3 = vmul.f32 %v259_v62, %v192_v60 }
 0x22c   :  { %v216_v4 = vsel %vm167_vm1, %v215_v3, 0.0 }
 0x290   :  { %v180_v0 = vpop.xlane.xlu1 %179 }
 0x291   :  { %vm181_vm3 = vcmp.eq.f32.partialorder %v178_v58, %v180_v0  ;;  %v186_v10 = vcvt.f32.s32 %v180_v0 }
 0x292   :  { %v182_v2 = vsel %vm181_vm3, %v177_v1, inf }
 0x293   :  { %183 = vmin.xlane.f32.xlu2 %v182_v2  ;;  %v187_v14 = vshll.u32 %v186_v10, 16 }
 0x29b   :  { %217 = vadd.xlane.f32.xlu2 %v216_v4 }
 0x29d   :  { %v196_v5 = vpop.xlane.xlu1 %195 }
 0x29e   :  { %260 = vrcp.f32 %v196_v5  ;;  %v210_v17 = vand.u32 2147483648, %v196_v5  ;;  %vm204_vm5 = vweird.f32 %v196_v5  ;;  %v208_v19 = vand.u32 2147483647, %v196_v5 }
 0x29f   :  { %262 = vlog2.f32 %v196_v5 }
 0x2a0   :  { %v211_v23 = vor.u32 1.1754944e-38, %v210_v17  ;;  %vm209_vm8 = vcmp.eq.f32.partialorder %v208_v19, 8.507059e+37 }
 0x2a4   :  { %v261_v6 = vpop.eup %260 }
 0x2a5   :  { %v200_v7 = vmul.f32 %v261_v6, %v196_v5  ;;  %v263_v9 = vpop.eup %262  ;;  %vm205_vm4 = vweird.f32 %v261_v6 }
 0x2a6   :  { %v198_v13 = vmul.f32 0.6931472, %v263_v9  ;;  %vm206_vm6 = vmor %vm204_vm5, %vm205_vm4 }
 0x2a7   :  { %v201_v8 = vsub.f32 1.0, %v200_v7 }
 0x2a8   :  { %v214_v20 = vsub.f32 %v192_v60, %v198_v13 }
 0x2a9   :  { %v202_v11 = vmul.f32 %v261_v6, %v201_v8 }
 0x2ab   :  { %v203_v16 = vadd.f32 %v261_v6, %v202_v11 }
 0x2ad   :  { %v207_v21 = vsel %vm206_vm6, %v261_v6, %v203_v16 }
 0x2ae   :  { %v212_v25 = vsel %vm209_vm8, %v211_v23, %v207_v21 }
 0x306   :  { %v184_v12 = vpop.xlane.xlu2 %183 }
 0x307   :  { %v185_v15 = vcvt.f32.s32 %v184_v12 }
 0x309   :  { %v188_v18 = vadd.s32 %v187_v14, %v185_v15 }
 0x30b   :  { %vm221_vm7 = vcmp.eq.s32.totalorder %v401_v49, %v188_v18  ;;  %v225_v24 = vcvt.s32.f32 %v188_v18 }
 0x30c   :  { %v222_v22 = vsel %vm221_vm7, %v214_v20, 0.0 }
 0x30d   :  { %223 = vadd.xlane.f32.xlu0 %v222_v22  ;;  %v229_v29 = vsel %vm228_vm9, %v225_v24, 0.0 }
 0x30e   :  { %v218_v26 = vpop.xlane.xlu2 %217 }
 0x30f   :  { %v219_v27 = vmul.f32 %v218_v26, %v212_v25 }
 0x311   :  { %v220_v28 = vsub.f32 %v198_v13, %v219_v27 }
 0x313   :  { %v230_v30 = vsel %vm227_vm10, %v220_v28, %v229_v29 }
 0x380   :  { %v224_v31 = vpop.xlane.xlu0 %223 }
 0x381   :  { %v231_v32 = vsel %vm226_vm11, %v224_v31, %v230_v30 }
 0x382   :  { %232 = vst [vmem:[#allocation8] sm:$0xff] %v231_v32 }
 0x383   :  { %243 = dma.vmem_to_hbm [thread:$0]  %s239_s2, 128, %s241_s30, [#allocation4]  }
 0x384   :  { %364 = dma.done.wait [#allocation4], 128  }
 0x385   :  { %365 = vsyncadd [#allocation4], 4294967168 }
 0x386   :  { %248 = vsyncpa [#allocation3], 1 }
 0x387   :  { %249 = vsyncpa [#allocation6], 1 }
 0x388   :  { %250 = vsyncpa [#allocation4], 1 }

</bundles_post_ra>
